<compile_context>
chip_gen: v7x
topology: tpu7x:2x2x1
jax: 0.10.0
libtpu: 0.0.40
codegen_flags: <defaults>
</compile_context>

<pallas_src>
import functools

import jax
import jax.numpy as jnp
from jax import lax
from jax.experimental import pallas as pl
from jax.experimental.pallas import tpu as pltpu


_NPRED = 21  # (3 xyz + 4 wpqr) per head, 3 heads


def _pose_loss_kernel(packed_ref, o_ref, *,
                      w1_xyz, w2_xyz, w3_xyz, w1_wpqr, w2_wpqr, w3_wpqr):
    preds = packed_ref[0]            # (B, 128): predictions at lanes 0:21
    gt = packed_ref[1]               # (B, 128): [xyz|wpqr] x3 at lanes 0:21
    B = preds.shape[0]

    lane = lax.broadcasted_iota(jnp.int32, (1, 128), 1)
    in_g1 = lane < 7
    in_g2 = (lane >= 7) & (lane < 14)
    wpqr1 = (lane >= 3) & (lane < 7)                      # first GT wpqr copy
    is_wpqr = (wpqr1
               | ((lane >= 10) & (lane < 14))
               | ((lane >= 17) & (lane < 21)))
    in_pred = lane < _NPRED

    # --- F.normalize(wpqr_gt, eps=1e-12): masked lane reduction + rsqrt ---
    gt_sq = gt * gt
    sumsq = jnp.sum(jnp.where(wpqr1, gt_sq, 0.0), axis=1, keepdims=True)  # (B,1)
    inv_norm = lax.rsqrt(jnp.maximum(sumsq, 1e-24))       # == 1 / max(||q||,1e-12)
    target = jnp.where(is_wpqr, gt * inv_norm, gt)        # normalized GT, lane-aligned

    # --- fused weighted MSE: per-lane weights fold w_xyz, w_xyz*w_wpqr and the
    #     mean denominators 1/(3B), 1/(4B); zero on padding lanes ---
    inv3b = 1.0 / (3.0 * B)
    inv4b = 1.0 / (4.0 * B)
    w_x = jnp.where(in_g1, w1_xyz * inv3b,
                    jnp.where(in_g2, w2_xyz * inv3b, w3_xyz * inv3b))
    w_q = jnp.where(in_g1, w1_xyz * w1_wpqr * inv4b,
                    jnp.where(in_g2, w2_xyz * w2_wpqr * inv4b,
                              w3_xyz * w3_wpqr * inv4b))
    wvec = jnp.where(in_pred, jnp.where(is_wpqr, w_q, w_x), 0.0)   # (1,128)

    diff = preds - target
    o_ref[0, 0] = jnp.sum(wvec * diff * diff)             # single full reduction


def pose_loss(p1_xyz, p1_wpqr, p2_xyz, p2_wpqr, p3_xyz, p3_wpqr, poseGT,
              *, w1_xyz, w2_xyz, w3_xyz, w1_wpqr, w2_wpqr, w3_wpqr):
    f32 = jnp.float32
    # Wrapper-side packing is pure layout plumbing: one lane-dense slab, one DMA.
    preds = jnp.concatenate(
        [p1_xyz, p1_wpqr, p2_xyz, p2_wpqr, p3_xyz, p3_wpqr], axis=1).astype(f32)
    gts = jnp.tile(poseGT.astype(f32), (1, 3))                   # (B, 21)
    slab = jnp.stack([preds, gts], axis=0)                       # (2, B, 21)
    packed = jnp.pad(slab, ((0, 0), (0, 0), (0, 128 - _NPRED)))  # (2, B, 128)

    kernel = functools.partial(
        _pose_loss_kernel,
        w1_xyz=float(w1_xyz), w2_xyz=float(w2_xyz), w3_xyz=float(w3_xyz),
        w1_wpqr=float(w1_wpqr), w2_wpqr=float(w2_wpqr), w3_wpqr=float(w3_wpqr))

    out = pl.pallas_call(
        kernel,
        out_shape=jax.ShapeDtypeStruct((1, 1), jnp.float32),
        in_specs=[pl.BlockSpec(memory_space=pltpu.MemorySpace.VMEM)],
        out_specs=pl.BlockSpec(memory_space=pltpu.MemorySpace.SMEM),
    )(packed)
    return out[0, 0]


def _pose_loss_ref(p1_xyz, p1_wpqr, p2_xyz, p2_wpqr, p3_xyz, p3_wpqr, poseGT,
                   *, w1_xyz, w2_xyz, w3_xyz, w1_wpqr, w2_wpqr, w3_wpqr):
    xyz_gt = poseGT[:, :3]
    wpqr_gt = poseGT[:, 3:]
    n = jnp.maximum(jnp.linalg.norm(wpqr_gt, axis=1, keepdims=True), 1e-12)
    wpqr_gt = wpqr_gt / n
    mse = lambda a, b: jnp.mean((a - b) ** 2)
    l1 = mse(p1_xyz, xyz_gt) + w1_wpqr * mse(p1_wpqr, wpqr_gt)
    l2 = mse(p2_xyz, xyz_gt) + w2_wpqr * mse(p2_wpqr, wpqr_gt)
    l3 = mse(p3_xyz, xyz_gt) + w3_wpqr * mse(p3_wpqr, wpqr_gt)
    return w1_xyz * l1 + w2_xyz * l2 + w3_xyz * l3


if __name__ == "__main__":
    # Deterministic loss weights (standard PoseNet auxiliary weighting).
    weights = dict(w1_xyz=0.3, w2_xyz=0.3, w3_xyz=1.0,
                   w1_wpqr=150.0, w2_wpqr=150.0, w3_wpqr=500.0)

    B = 8
    key = jax.random.PRNGKey(0)
    k = jax.random.split(key, 7)
    p1_xyz = jax.random.normal(k[0], (B, 3), jnp.float32)
    p1_wpqr = jax.random.normal(k[1], (B, 4), jnp.float32)
    p2_xyz = jax.random.normal(k[2], (B, 3), jnp.float32)
    p2_wpqr = jax.random.normal(k[3], (B, 4), jnp.float32)
    p3_xyz = jax.random.normal(k[4], (B, 3), jnp.float32)
    p3_wpqr = jax.random.normal(k[5], (B, 4), jnp.float32)
    poseGT = jax.random.normal(k[6], (B, 7), jnp.float32)

    loss = pose_loss(p1_xyz, p1_wpqr, p2_xyz, p2_wpqr, p3_xyz, p3_wpqr, poseGT,
                     **weights)
    loss = jax.block_until_ready(loss)

    ref = _pose_loss_ref(p1_xyz, p1_wpqr, p2_xyz, p2_wpqr, p3_xyz, p3_wpqr,
                         poseGT, **weights)
    assert jnp.abs(loss - ref) <= 1e-3 * (1.0 + jnp.abs(ref)), (loss, ref)

    print("KERNEL_OK")
</pallas_src>

<mosaic_0001>
module attributes {stable_mosaic.version = 11 : i64} {
  func.func @_pose_loss_kernel(%arg0: memref<2x8x128xf32, #tpu.memory_space<vmem>>, %arg1: memref<1x1xf32, #tpu.memory_space<smem>>) attributes {dimension_semantics = [], scalar_prefetch = 0 : i64, scratch_operands = 0 : i64, tpu.core_type = #tpu.core_type<tc>} {
    %c0 = arith.constant 0 : index
    %c0_0 = arith.constant 0 : index
    %c0_1 = arith.constant 0 : index
    %0 = vector.load %arg0[%c0, %c0_0, %c0_1] : memref<2x8x128xf32, #tpu.memory_space<vmem>>, vector<1x8x128xf32>
    %1 = vector.shape_cast %0 : vector<1x8x128xf32> to vector<8x128xf32>
    %c1 = arith.constant 1 : index
    %c0_2 = arith.constant 0 : index
    %c0_3 = arith.constant 0 : index
    %2 = vector.load %arg0[%c1, %c0_2, %c0_3] : memref<2x8x128xf32, #tpu.memory_space<vmem>>, vector<1x8x128xf32>
    %3 = vector.shape_cast %2 : vector<1x8x128xf32> to vector<8x128xf32>
    %4 = tpu.iota {dimensions = array<i32: 1>} : vector<1x128xi32>
    %c7_i32 = arith.constant 7 : i32
    %5 = vector.broadcast %c7_i32 : i32 to vector<1x128xi32>
    %6 = arith.cmpi slt, %4, %5 : vector<1x128xi32>
    %c7_i32_4 = arith.constant 7 : i32
    %7 = vector.broadcast %c7_i32_4 : i32 to vector<1x128xi32>
    %8 = arith.cmpi sge, %4, %7 : vector<1x128xi32>
    %c14_i32 = arith.constant 14 : i32
    %9 = vector.broadcast %c14_i32 : i32 to vector<1x128xi32>
    %10 = arith.cmpi slt, %4, %9 : vector<1x128xi32>
    %11 = arith.andi %8, %10 : vector<1x128xi1>
    %c3_i32 = arith.constant 3 : i32
    %12 = vector.broadcast %c3_i32 : i32 to vector<1x128xi32>
    %13 = arith.cmpi sge, %4, %12 : vector<1x128xi32>
    %c7_i32_5 = arith.constant 7 : i32
    %14 = vector.broadcast %c7_i32_5 : i32 to vector<1x128xi32>
    %15 = arith.cmpi slt, %4, %14 : vector<1x128xi32>
    %16 = arith.andi %13, %15 : vector<1x128xi1>
    %c10_i32 = arith.constant 10 : i32
    %17 = vector.broadcast %c10_i32 : i32 to vector<1x128xi32>
    %18 = arith.cmpi sge, %4, %17 : vector<1x128xi32>
    %c14_i32_6 = arith.constant 14 : i32
    %19 = vector.broadcast %c14_i32_6 : i32 to vector<1x128xi32>
    %20 = arith.cmpi slt, %4, %19 : vector<1x128xi32>
    %21 = arith.andi %18, %20 : vector<1x128xi1>
    %22 = arith.ori %16, %21 : vector<1x128xi1>
    %c17_i32 = arith.constant 17 : i32
    %23 = vector.broadcast %c17_i32 : i32 to vector<1x128xi32>
    %24 = arith.cmpi sge, %4, %23 : vector<1x128xi32>
    %c21_i32 = arith.constant 21 : i32
    %25 = vector.broadcast %c21_i32 : i32 to vector<1x128xi32>
    %26 = arith.cmpi slt, %4, %25 : vector<1x128xi32>
    %27 = arith.andi %24, %26 : vector<1x128xi1>
    %28 = arith.ori %22, %27 : vector<1x128xi1>
    %c21_i32_7 = arith.constant 21 : i32
    %29 = vector.broadcast %c21_i32_7 : i32 to vector<1x128xi32>
    %30 = arith.cmpi slt, %4, %29 : vector<1x128xi32>
    %31 = arith.mulf %3, %3 : vector<8x128xf32>
    %cst = arith.constant 0.000000e+00 : f32
    %32 = vector.shape_cast %16 : vector<1x128xi1> to vector<1x128xi1>
    %33 = vector.broadcast %32 : vector<1x128xi1> to vector<8x128xi1>
    %34 = vector.broadcast %cst : f32 to vector<8x128xf32>
    %35 = arith.select %33, %31, %34 : vector<8x128xi1>, vector<8x128xf32>
    %cst_8 = arith.constant dense<0.000000e+00> : vector<8xf32>
    %36 = vector.multi_reduction <add>, %35, %cst_8 [1] : vector<8x128xf32> to vector<8xf32>
    %37 = vector.shape_cast %36 : vector<8xf32> to vector<8x1xf32>
    %cst_9 = arith.constant 1.000000e-24 : f32
    %38 = vector.broadcast %cst_9 : f32 to vector<8x1xf32>
    %39 = arith.maximumf %37, %38 : vector<8x1xf32>
    %40 = math.rsqrt %39 : vector<8x1xf32>
    %41 = vector.broadcast %40 : vector<8x1xf32> to vector<8x128xf32>
    %42 = arith.mulf %3, %41 : vector<8x128xf32>
    %43 = vector.shape_cast %28 : vector<1x128xi1> to vector<1x128xi1>
    %44 = vector.broadcast %43 : vector<1x128xi1> to vector<8x128xi1>
    %45 = arith.select %44, %42, %3 : vector<8x128xi1>, vector<8x128xf32>
    %cst_10 = arith.constant 1.250000e-02 : f32
    %cst_11 = arith.constant 0.0416666679 : f32
    %46 = vector.broadcast %cst_10 : f32 to vector<1x128xf32>
    %47 = vector.broadcast %cst_11 : f32 to vector<1x128xf32>
    %48 = arith.select %11, %46, %47 : vector<1x128xi1>, vector<1x128xf32>
    %cst_12 = arith.constant 1.250000e-02 : f32
    %49 = vector.broadcast %cst_12 : f32 to vector<1x128xf32>
    %50 = arith.select %6, %49, %48 : vector<1x128xi1>, vector<1x128xf32>
    %cst_13 = arith.constant 1.406250e+00 : f32
    %cst_14 = arith.constant 1.562500e+01 : f32
    %51 = vector.broadcast %cst_13 : f32 to vector<1x128xf32>
    %52 = vector.broadcast %cst_14 : f32 to vector<1x128xf32>
    %53 = arith.select %11, %51, %52 : vector<1x128xi1>, vector<1x128xf32>
    %cst_15 = arith.constant 1.406250e+00 : f32
    %54 = vector.broadcast %cst_15 : f32 to vector<1x128xf32>
    %55 = arith.select %6, %54, %53 : vector<1x128xi1>, vector<1x128xf32>
    %56 = arith.select %28, %55, %50 : vector<1x128xi1>, vector<1x128xf32>
    %cst_16 = arith.constant 0.000000e+00 : f32
    %57 = vector.broadcast %cst_16 : f32 to vector<1x128xf32>
    %58 = arith.select %30, %56, %57 : vector<1x128xi1>, vector<1x128xf32>
    %59 = arith.subf %1, %45 : vector<8x128xf32>
    %60 = vector.broadcast %58 : vector<1x128xf32> to vector<8x128xf32>
    %61 = arith.mulf %60, %59 : vector<8x128xf32>
    %62 = arith.mulf %61, %59 : vector<8x128xf32>
    %63 = vector.shape_cast %62 : vector<8x128xf32> to vector<1x8x128xf32>
    %cst_17 = arith.constant dense<0.000000e+00> : vector<1xf32>
    %64 = vector.multi_reduction <add>, %63, %cst_17 [1, 2] : vector<1x8x128xf32> to vector<1xf32>
    %65 = vector.shape_cast %64 : vector<1xf32> to vector<1x1x1xf32>
    %66 = vector.extract %65[0, 0, 0] : f32 from vector<1x1x1xf32>
    %c0_18 = arith.constant 0 : index
    %c0_19 = arith.constant 0 : index
    %67 = memref.load %arg1[%c0_18, %c0_19] : memref<1x1xf32, #tpu.memory_space<smem>>
    memref.store %66, %arg1[%c0_18, %c0_19] : memref<1x1xf32, #tpu.memory_space<smem>>
    return
  }
}

</mosaic_0001>

<bundles_post_ra>
// kernel: tpu_custom_call.1
= control target key start
LH: loop header
LB: loop body
LE: loop exit
PB: predicated region body
PF: predicated region fallthrough
CT: control target
= control target key end

     0   :  { %6 = vsyncpa [#allocation3], 0  ;;  %s186_s0 = inlined_call_operand.hbm [shape: f32[2,8,128], index: 0, kind: input, shape index: {}]   ;;  %s187_s1 = inlined_call_operand.hbm [shape: f32[1,1], index: 1, kind: output, shape index: {}]  }
   0x1   :  { %7 = vsyncpa [#allocation4], 0  ;;  %s133_s6 = smov [#allocation2]   ;;  %s97_s10 = scalar_lea.hbm %s186_s0, 256 }
   0x2   :  { %s13_s7 = sshll.u32 %s133_s6, 4  ;;  %p98_p0 = scmp.ne.s32.totalorder %s186_s0, %s97_s10  ;;  %s14_s7 = int_to_ptr.vmem [resolvable:$true] %s13_s7 }
   0x3   :  { %p101_p1 = scmp.lt.u32.totalorder %s97_s10, %s186_s0 }
   0x5   :  { %p103_p2 = pnand %p101_p1, %p98_p0 }
   0x7   :  { %106 = shalt.err (!%p103_p2)
}
   0x8   :  { %s107_s15 = scalar_lea.vmem %s14_s7, 256  ;;  %p112_p4 = scmp.lt.s32.totalorder %s14_s7, %s14_s7 }
   0x9   :  { %p108_p3 = scmp.ne.s32.totalorder %s14_s7, %s107_s15  ;;  %p113_p5 = scmp.lt.s32.totalorder %s107_s15, %s107_s15 }
   0xb   :  { %p114_p6 = por %p113_p5, %p112_p4 }
   0xd   :  { %p115_p7 = pnand %p114_p6, %p108_p3 }
   0xf   :  { %118 = shalt.err (!%p115_p7)
}
  0x10   :  { %s134_s16 = smov 128   ;;  %s135_s17 = smov 8  }
  0x11   :  { %19 = dma.hbm_to_vmem [thread:$0]  %s186_s0, 256, %s14_s7, [#allocation3], %s134_s16, %s134_s16, %s135_s17  }
  0x12   :  { %129 = dma.done.wait [#allocation3], 256  }
  0x13   :  { %130 = vsyncadd [#allocation3], 4294967040  ;;  %v26_v0 = vlaneseq  ;;  %v136_v3 = vmov 0.041666668   ;;  %v137_v5 = vmov 15.625   ;;  %v25_v7 = vld [vmem:[#allocation2 + $0x8] sm:$0xff] }
  0x14   :  { %v41_v10 = vmul.f32 %v25_v7, %v25_v7  ;;  %v23_v17 = vld [vmem:[#allocation2] sm:$0xff]  ;;  %s119_s22 = scalar_lea.hbm %s187_s1, 16 }
  0x15   :  { %v27_v1 = vand.u32 127, %v26_v0  ;;  %p120_p8 = scmp.ne.s32.totalorder %s187_s1, %s119_s22  ;;  %p123_p9 = scmp.lt.u32.totalorder %s119_s22, %s187_s1 }
  0x17   :  { %vm28_vm0 = vcmp.lt.s32.totalorder %v27_v1, 7  ;;  %vm29_vm1 = vcmp.ge.s32.totalorder %v27_v1, 7  ;;  %vm30_vm2 = vcmp.lt.s32.totalorder %v27_v1, 14  ;;  %vm32_vm3 = vcmp.ge.s32.totalorder %v27_v1, 3  ;;  %p125_p10 = pnand %p123_p9, %p120_p8 }
  0x18   :  { %vm31_vm4 = vmand %vm29_vm1, %vm30_vm2  ;;  %vm34_vm5 = vcmp.ge.s32.totalorder %v27_v1, 10  ;;  %vm37_vm7 = vcmp.ge.s32.totalorder %v27_v1, 17  ;;  %vm38_vm8 = vcmp.lt.s32.totalorder %v27_v1, 21 }
  0x19   :  { %vm162_vm6 = vmand %vm32_vm3, %vm28_vm0  ;;  %v53_v4 = vsel %vm31_vm4, 0.0125, %v136_v3  ;;  %v55_v6 = vsel %vm31_vm4, 1.40625, %v137_v5 }
  0x1a   :  { %vm35_vm9 = vmand %vm34_vm5, %vm30_vm2  ;;  %v54_v8 = vsel %vm28_vm0, 0.0125, %v53_v4  ;;  %v56_v9 = vsel %vm28_vm0, 1.40625, %v55_v6  ;;  %v44_v11 = vsel %vm162_vm6, %v41_v10, 0.0 }
  0x1b   :  { %vm36_vm10 = vmor %vm162_vm6, %vm35_vm9  ;;  %45 = vadd.xlane.f32.xlu0 %v44_v11 }
  0x1c   :  { %vm39_vm11 = vmand %vm37_vm7, %vm38_vm8 }
  0x1d   :  { %vm40_vm12 = vmor %vm36_vm10, %vm39_vm11 }
  0x1e   :  { %v57_v12 = vsel %vm40_vm12, %v56_v9, %v54_v8 }
  0x1f   :  { %v58_v13 = vsel %vm38_vm8, %v57_v12, 0.0 }
  0xa8   :  { %v46_v14 = vpop.xlane.xlu0 %45 }
  0xa9   :  { %v47_v15 = vmax.f32 %v46_v14, 1e-24 }
  0xab   :  { %95 = vrsqrt.f32 %v47_v15 }
  0xb5   :  { %v96_v16 = vpop.eup %95 }
  0xb6   :  { %v49_v18 = vmul.f32 %v96_v16, %v25_v7 }
  0xb8   :  { %v52_v19 = vsel %vm40_vm12, %v49_v18, %v25_v7 }
  0xb9   :  { %v59_v20 = vsub.f32 %v23_v17, %v52_v19 }
  0xbb   :  { %v60_v21 = vmul.f32 %v59_v20, %v58_v13 }
  0xbd   :  { %v61_v22 = vmul.f32 %v60_v21, %v59_v20 }
  0xbf   :  { %62 = vadd.xlane.f32.xlu0 %v61_v22 }
 0x14c   :  { %v63_v23 = vpop.xlane.xlu0 %62 }
 0x14d   :  { %v64_v24 = vrot.slane %v63_v23, 4 }
 0x14f   :  { %v65_v25 = vadd.f32 %v64_v24, %v63_v23 }
 0x151   :  { %v66_v26 = vrot.slane %v65_v25, 2 }
 0x153   :  { %v67_v27 = vadd.f32 %v66_v26, %v65_v25 }
 0x155   :  { %v68_v28 = vrot.slane %v67_v27, 1 }
 0x157   :  { %v69_v29 = vadd.f32 %v68_v28, %v67_v27 }
 0x159   :  { %87 = vpush %v69_v29 }
 0x18a   :  { %s88_s0 = spop %87 }
 0x18b   :  { %72 = sst [smem:[#allocation5]] %s88_s0 }
 0x18c   :  { %128 = shalt.err (!%p125_p10)
}
 0x18d   :  { %s138_s27 = smov [#allocation5]  }
 0x18e   :  { %80 = dma.smem_to_hbm %s138_s27, 16, %s187_s1, [#allocation4]  }
 0x18f   :  { %131 = dma.done.wait [#allocation4], 16  }
 0x190   :  { %132 = vsyncadd [#allocation4], 4294967280 }
 0x191   :  { %84 = sfence }
 0x192   :  { %85 = vsyncpa [#allocation3], 1 }
 0x193   :  { %86 = vsyncpa [#allocation4], 1 }

</bundles_post_ra>
